<compile_context>
chip_gen: v5e
topology: v5e:2x2
jax: 0.10.0
libtpu: 0.0.40
codegen_flags: <defaults>
</compile_context>

<pallas_src>
import functools
import math

import jax
import jax.numpy as jnp
from jax import lax
from jax.experimental import pallas as pl
from jax.experimental.pallas import tpu as pltpu


def mha_kernel(x_ref, y_ref, wqkv_ref, bqkv_ref, wo_ref, bo_ref,
               out_ref, scores_ref, *, n_heads, dk, dv, norm_fact):
    """One batch element: all heads, both projections, softmax, output proj.

    x_ref      : [1, L, D]       query/key-side input block (batch b)
    y_ref      : [1, L, D]       value-side input block (batch b)
    wqkv_ref   : [D, 2*H*dk+H*dv] fused (Wq|Wk|Wv)^T          (grid-invariant)
    bqkv_ref   : [1, 2*H*dk+H*dv] fused (bq|bk|bv)            (grid-invariant)
    wo_ref     : [H*dv, Dp]      Wo^T, lane-padded to Dp=128  (grid-invariant)
    bo_ref     : [1, Dp]         bo, lane-padded              (grid-invariant)
    out_ref    : [1, L, Dp]      final output block (lane-dense store)
    scores_ref : [1, H, L, L]    softmax attention probabilities for batch b
    """
    L = x_ref.shape[1]
    H = n_heads

    x = x_ref[0]                                              # [L, D]
    y = y_ref[0]                                              # [L, D]

    # Fused QKV projection: one MXU push.  Q/K use x, V uses y, so stack rows
    # and apply the fused weight once ([2L, D] @ [D, 2*H*dk + H*dv]).
    xy = jnp.concatenate([x, y], axis=0)                      # [2L, D]
    proj = jnp.dot(xy, wqkv_ref[...],
                   preferred_element_type=jnp.float32) + bqkv_ref[...]
    q = proj[:L, :H * dk]                                     # rows from x
    k = proj[:L, H * dk:2 * H * dk]                           # rows from x
    v = proj[L:2 * L, 2 * H * dk:]                            # rows from y

    # Per-head attention; H=4 is tiny and static, so unroll in Python.
    probs = []
    ctxs = []
    for h in range(H):
        qh = q[:, h * dk:(h + 1) * dk]                        # [L, dk]
        kh = k[:, h * dk:(h + 1) * dk]                        # [L, dk]
        vh = v[:, h * dv:(h + 1) * dv]                        # [L, dv]

        # s[l, s] = sum_e qh[l, e] * kh[s, e]  (contract feature dim)
        s = lax.dot_general(qh, kh, (((1,), (1,)), ((), ())),
                            preferred_element_type=jnp.float32) * norm_fact
        s = s - jnp.max(s, axis=-1, keepdims=True)
        e = jnp.exp(s)
        denom = jnp.sum(e, axis=-1, keepdims=True)
        p = e * pl.reciprocal(denom, approx=True)             # EUP rcp, not VPU div
        probs.append(p)
        ctxs.append(jnp.dot(p, vh, preferred_element_type=jnp.float32))

    # Single store of the whole (H, L, L) scores block for this batch entry.
    scores_ref[0] = jnp.stack(probs, axis=0).astype(scores_ref.dtype)

    # Output projection: one [L, H*dv] @ [H*dv, Dp] push, lane-dense store.
    ctx = jnp.concatenate(ctxs, axis=1)                       # [L, H*dv]
    out = jnp.dot(ctx, wo_ref[...],
                  preferred_element_type=jnp.float32) + bo_ref[...]
    out_ref[0] = out.astype(out_ref.dtype)


def multihead_attention(x, y, wq, bq, wk, bk, wv, bv, wo, bo, n_heads):
    """x, y: [B, L, D]. PyTorch-Linear weights (W: [out, in]). Returns (out, scores)."""
    B, L, D = x.shape
    H = n_heads
    dk = wq.shape[0] // H
    dv = wv.shape[0] // H
    Dp = pl.cdiv(D, 128) * 128            # lane-dense padded output width

    # Single fused QKV weight / bias operand (feature order: q | k | v,
    # each head-major to match the reshape(B, L, H, -1) in the module).
    wqkv = jnp.concatenate([wq, wk, wv], axis=0).T            # [D, 2*H*dk + H*dv]
    bqkv = jnp.concatenate([bq, bk, bv]).reshape(1, -1)       # [1, 2*H*dk + H*dv]
    Wtot = wqkv.shape[1]

    # Output projection transposed and zero-padded on d_model so the final
    # store is lane-dense (result sliced back below).
    wo_t = jnp.pad(wo.T, ((0, 0), (0, Dp - D)))               # [H*dv, Dp]
    bo_p = jnp.pad(bo, (0, Dp - D)).reshape(1, Dp)            # [1, Dp]

    norm_fact = 1.0 / math.sqrt(D)        # matches the module: 1/sqrt(d_model)
    kernel = functools.partial(mha_kernel, n_heads=H, dk=dk, dv=dv,
                               norm_fact=norm_fact)

    out_p, scores = pl.pallas_call(
        kernel,
        out_shape=(jax.ShapeDtypeStruct((B, L, Dp), x.dtype),
                   jax.ShapeDtypeStruct((B, H, L, L), jnp.float32)),
        grid_spec=pltpu.PrefetchScalarGridSpec(
            num_scalar_prefetch=0,
            grid=(B,),
            in_specs=[
                pl.BlockSpec((1, L, D), lambda b: (b, 0, 0)),      # x
                pl.BlockSpec((1, L, D), lambda b: (b, 0, 0)),      # y
                pl.BlockSpec((D, Wtot), lambda b: (0, 0)),         # fused Wqkv (resident)
                pl.BlockSpec((1, Wtot), lambda b: (0, 0)),         # fused bqkv (resident)
                pl.BlockSpec((H * dv, Dp), lambda b: (0, 0)),      # Wo^T padded (resident)
                pl.BlockSpec((1, Dp), lambda b: (0, 0)),           # bo padded   (resident)
            ],
            out_specs=(
                pl.BlockSpec((1, L, Dp), lambda b: (b, 0, 0)),         # out
                pl.BlockSpec((1, H, L, L), lambda b: (b, 0, 0, 0)),    # scores
            ),
        ),
        compiler_params=pltpu.CompilerParams(
            dimension_semantics=("parallel",)),   # B shards across v7x's 2 TCs
    )(x, y, wqkv, bqkv, wo_t, bo_p)

    return out_p[:, :, :D], scores


def mha_ref(x, y, wq, bq, wk, bk, wv, bv, wo, bo, n_heads):
    """Plain-JAX reference mirroring the PyTorch forward exactly."""
    B, L, D = x.shape
    dk = wq.shape[0] // n_heads
    dv = wv.shape[0] // n_heads
    hp = lax.Precision.HIGHEST
    Q = (jnp.matmul(x, wq.T, precision=hp) + bq).reshape(B, L, n_heads, dk)
    K = (jnp.matmul(x, wk.T, precision=hp) + bk).reshape(B, L, n_heads, dk)
    V = (jnp.matmul(y, wv.T, precision=hp) + bv).reshape(B, L, n_heads, dv)
    scores = jnp.einsum('blhe,bshe->bhls', Q, K, precision=hp) * (1.0 / math.sqrt(D))
    scores = jax.nn.softmax(scores, axis=-1)
    output = jnp.einsum('bhls,bshd->blhd', scores, V, precision=hp)
    output = output.reshape(B, L, n_heads * dv)
    out = jnp.matmul(output, wo.T, precision=hp) + bo
    return out, scores


if __name__ == "__main__":
    B, L, D = 2, 8, 32          # batch, sequence length, d_model
    dim_k, dim_v, n_heads = 16, 16, 4

    key = jax.random.PRNGKey(0)
    kx, ky, k1, k2, k3, k4, k5, k6, k7, k8 = jax.random.split(key, 10)

    x = jax.random.normal(kx, (B, L, D), dtype=jnp.float32)
    y = jax.random.normal(ky, (B, L, D), dtype=jnp.float32)

    def init_linear(kw, kb, out_f, in_f):
        bound = 1.0 / math.sqrt(in_f)          # PyTorch nn.Linear default init range
        w = jax.random.uniform(kw, (out_f, in_f), jnp.float32, -bound, bound)
        b = jax.random.uniform(kb, (out_f,), jnp.float32, -bound, bound)
        return w, b

    wq, bq = init_linear(k1, k2, dim_k * n_heads, D)
    wk, bk = init_linear(k3, k4, dim_k * n_heads, D)
    wv, bv = init_linear(k5, k6, dim_v * n_heads, D)
    wo, bo = init_linear(k7, k8, D, dim_v * n_heads)

    out, scores = multihead_attention(x, y, wq, bq, wk, bk, wv, bv, wo, bo, n_heads)
    out = jax.block_until_ready(out)
    scores = jax.block_until_ready(scores)

    ref_out, ref_scores = mha_ref(x, y, wq, bq, wk, bk, wv, bv, wo, bo, n_heads)

    assert out.shape == (B, L, D)
    assert scores.shape == (B, n_heads, L, L)
    err_o = float(jnp.max(jnp.abs(out - ref_out)))
    err_s = float(jnp.max(jnp.abs(scores - ref_scores)))
    assert jnp.allclose(out, ref_out, atol=1e-3, rtol=1e-3), err_o
    assert jnp.allclose(scores, ref_scores, atol=1e-3, rtol=1e-3), err_s
    print("KERNEL_OK")
</pallas_src>

<mosaic_0001>
module attributes {stable_mosaic.version = 11 : i64} {
  func.func @mha_kernel(%arg0: i32, %arg1: memref<1x8x32xf32, #tpu.memory_space<vmem>>, %arg2: memref<1x8x32xf32, #tpu.memory_space<vmem>>, %arg3: memref<32x192xf32, #tpu.memory_space<vmem>>, %arg4: memref<1x192xf32, #tpu.memory_space<vmem>>, %arg5: memref<64x128xf32, #tpu.memory_space<vmem>>, %arg6: memref<1x128xf32, #tpu.memory_space<vmem>>, %arg7: memref<1x8x128xf32, #tpu.memory_space<vmem>>, %arg8: memref<1x4x8x8xf32, #tpu.memory_space<vmem>>) attributes {dimension_semantics = [#tpu.dimension_semantics<parallel>], iteration_bounds = array<i64: 2>, scalar_prefetch = 0 : i64, scratch_operands = 0 : i64, tpu.core_type = #tpu.core_type<tc>, window_params = [{transform_indices = @transform_0, window_bounds = array<i64: 1, 8, 32>}, {transform_indices = @transform_1, window_bounds = array<i64: 1, 8, 32>}, {pipeline_mode = #tpu.pipeline_mode<synchronous>, transform_indices = @transform_2, window_bounds = array<i64: 32, 192>}, {pipeline_mode = #tpu.pipeline_mode<synchronous>, transform_indices = @transform_3, window_bounds = array<i64: 1, 192>}, {pipeline_mode = #tpu.pipeline_mode<synchronous>, transform_indices = @transform_4, window_bounds = array<i64: 64, 128>}, {pipeline_mode = #tpu.pipeline_mode<synchronous>, transform_indices = @transform_5, window_bounds = array<i64: 1, 128>}, {transform_indices = @transform_6, window_bounds = array<i64: 1, 8, 128>}, {transform_indices = @transform_7, window_bounds = array<i64: 1, 4, 8, 8>}]} {
    %c0 = arith.constant 0 : index
    %c0_0 = arith.constant 0 : index
    %c0_1 = arith.constant 0 : index
    %0 = vector.load %arg1[%c0, %c0_0, %c0_1] : memref<1x8x32xf32, #tpu.memory_space<vmem>>, vector<1x8x32xf32>
    %1 = vector.shape_cast %0 : vector<1x8x32xf32> to vector<8x32xf32>
    %c0_2 = arith.constant 0 : index
    %c0_3 = arith.constant 0 : index
    %c0_4 = arith.constant 0 : index
    %2 = vector.load %arg2[%c0_2, %c0_3, %c0_4] : memref<1x8x32xf32, #tpu.memory_space<vmem>>, vector<1x8x32xf32>
    %3 = vector.shape_cast %2 : vector<1x8x32xf32> to vector<8x32xf32>
    %4 = tpu.concatenate %1, %3 in 0 : vector<8x32xf32>, vector<8x32xf32> -> vector<16x32xf32>
    %c0_5 = arith.constant 0 : index
    %c0_6 = arith.constant 0 : index
    %5 = vector.load %arg3[%c0_5, %c0_6] : memref<32x192xf32, #tpu.memory_space<vmem>>, vector<32x192xf32>
    %cst = arith.constant dense<0.000000e+00> : vector<16x192xf32>
    %6 = tpu.matmul %4, %5, %cst {dimension_numbers = #tpu.dot_dimension_numbers<[1], [0], [0], [1], [0, 0, 1, 1], [], []>} : vector<16x32xf32>, vector<32x192xf32>, vector<16x192xf32> -> vector<16x192xf32>
    %c0_7 = arith.constant 0 : index
    %c0_8 = arith.constant 0 : index
    %7 = vector.load %arg4[%c0_7, %c0_8] : memref<1x192xf32, #tpu.memory_space<vmem>>, vector<1x192xf32>
    %8 = vector.broadcast %7 : vector<1x192xf32> to vector<16x192xf32>
    %9 = arith.addf %6, %8 : vector<16x192xf32>
    %10 = vector.extract_strided_slice %9 {offsets = [0, 0], sizes = [8, 64], strides = [1, 1]} : vector<16x192xf32> to vector<8x64xf32>
    %11 = vector.extract_strided_slice %9 {offsets = [0, 64], sizes = [8, 64], strides = [1, 1]} : vector<16x192xf32> to vector<8x64xf32>
    %12 = vector.extract_strided_slice %9 {offsets = [8, 128], sizes = [8, 64], strides = [1, 1]} : vector<16x192xf32> to vector<8x64xf32>
    %13 = vector.extract_strided_slice %10 {offsets = [0, 0], sizes = [8, 16], strides = [1, 1]} : vector<8x64xf32> to vector<8x16xf32>
    %14 = vector.extract_strided_slice %11 {offsets = [0, 0], sizes = [8, 16], strides = [1, 1]} : vector<8x64xf32> to vector<8x16xf32>
    %15 = vector.extract_strided_slice %12 {offsets = [0, 0], sizes = [8, 16], strides = [1, 1]} : vector<8x64xf32> to vector<8x16xf32>
    %cst_9 = arith.constant dense<0.000000e+00> : vector<8x8xf32>
    %16 = tpu.matmul %13, %14, %cst_9 {dimension_numbers = #tpu.dot_dimension_numbers<[1], [1], [0], [0], [0, 0, 1, 0], [], []>} : vector<8x16xf32>, vector<8x16xf32>, vector<8x8xf32> -> vector<8x8xf32>
    %cst_10 = arith.constant 0.176776692 : f32
    %17 = vector.broadcast %cst_10 : f32 to vector<8x8xf32>
    %18 = arith.mulf %16, %17 : vector<8x8xf32>
    %cst_11 = arith.constant dense<0xFF800000> : vector<8xf32>
    %19 = vector.multi_reduction <maximumf>, %18, %cst_11 [1] : vector<8x8xf32> to vector<8xf32>
    %20 = vector.shape_cast %19 : vector<8xf32> to vector<8x1xf32>
    %21 = vector.broadcast %20 : vector<8x1xf32> to vector<8x8xf32>
    %22 = arith.subf %18, %21 : vector<8x8xf32>
    %23 = math.exp %22 : vector<8x8xf32>
    %cst_12 = arith.constant dense<0.000000e+00> : vector<8xf32>
    %24 = vector.multi_reduction <add>, %23, %cst_12 [1] : vector<8x8xf32> to vector<8xf32>
    %25 = vector.shape_cast %24 : vector<8xf32> to vector<8x1xf32>
    %26 = tpu.reciprocal %25 {approx = true} : vector<8x1xf32> -> vector<8x1xf32>
    %27 = vector.broadcast %26 : vector<8x1xf32> to vector<8x8xf32>
    %28 = arith.mulf %23, %27 : vector<8x8xf32>
    %cst_13 = arith.constant dense<0.000000e+00> : vector<8x16xf32>
    %29 = tpu.matmul %28, %15, %cst_13 {dimension_numbers = #tpu.dot_dimension_numbers<[1], [0], [0], [1], [0, 0, 1, 1], [], []>} : vector<8x8xf32>, vector<8x16xf32>, vector<8x16xf32> -> vector<8x16xf32>
    %30 = vector.extract_strided_slice %10 {offsets = [0, 16], sizes = [8, 16], strides = [1, 1]} : vector<8x64xf32> to vector<8x16xf32>
    %31 = vector.extract_strided_slice %11 {offsets = [0, 16], sizes = [8, 16], strides = [1, 1]} : vector<8x64xf32> to vector<8x16xf32>
    %32 = vector.extract_strided_slice %12 {offsets = [0, 16], sizes = [8, 16], strides = [1, 1]} : vector<8x64xf32> to vector<8x16xf32>
    %cst_14 = arith.constant dense<0.000000e+00> : vector<8x8xf32>
    %33 = tpu.matmul %30, %31, %cst_14 {dimension_numbers = #tpu.dot_dimension_numbers<[1], [1], [0], [0], [0, 0, 1, 0], [], []>} : vector<8x16xf32>, vector<8x16xf32>, vector<8x8xf32> -> vector<8x8xf32>
    %cst_15 = arith.constant 0.176776692 : f32
    %34 = vector.broadcast %cst_15 : f32 to vector<8x8xf32>
    %35 = arith.mulf %33, %34 : vector<8x8xf32>
    %cst_16 = arith.constant dense<0xFF800000> : vector<8xf32>
    %36 = vector.multi_reduction <maximumf>, %35, %cst_16 [1] : vector<8x8xf32> to vector<8xf32>
    %37 = vector.shape_cast %36 : vector<8xf32> to vector<8x1xf32>
    %38 = vector.broadcast %37 : vector<8x1xf32> to vector<8x8xf32>
    %39 = arith.subf %35, %38 : vector<8x8xf32>
    %40 = math.exp %39 : vector<8x8xf32>
    %cst_17 = arith.constant dense<0.000000e+00> : vector<8xf32>
    %41 = vector.multi_reduction <add>, %40, %cst_17 [1] : vector<8x8xf32> to vector<8xf32>
    %42 = vector.shape_cast %41 : vector<8xf32> to vector<8x1xf32>
    %43 = tpu.reciprocal %42 {approx = true} : vector<8x1xf32> -> vector<8x1xf32>
    %44 = vector.broadcast %43 : vector<8x1xf32> to vector<8x8xf32>
    %45 = arith.mulf %40, %44 : vector<8x8xf32>
    %cst_18 = arith.constant dense<0.000000e+00> : vector<8x16xf32>
    %46 = tpu.matmul %45, %32, %cst_18 {dimension_numbers = #tpu.dot_dimension_numbers<[1], [0], [0], [1], [0, 0, 1, 1], [], []>} : vector<8x8xf32>, vector<8x16xf32>, vector<8x16xf32> -> vector<8x16xf32>
    %47 = vector.extract_strided_slice %10 {offsets = [0, 32], sizes = [8, 16], strides = [1, 1]} : vector<8x64xf32> to vector<8x16xf32>
    %48 = vector.extract_strided_slice %11 {offsets = [0, 32], sizes = [8, 16], strides = [1, 1]} : vector<8x64xf32> to vector<8x16xf32>
    %49 = vector.extract_strided_slice %12 {offsets = [0, 32], sizes = [8, 16], strides = [1, 1]} : vector<8x64xf32> to vector<8x16xf32>
    %cst_19 = arith.constant dense<0.000000e+00> : vector<8x8xf32>
    %50 = tpu.matmul %47, %48, %cst_19 {dimension_numbers = #tpu.dot_dimension_numbers<[1], [1], [0], [0], [0, 0, 1, 0], [], []>} : vector<8x16xf32>, vector<8x16xf32>, vector<8x8xf32> -> vector<8x8xf32>
    %cst_20 = arith.constant 0.176776692 : f32
    %51 = vector.broadcast %cst_20 : f32 to vector<8x8xf32>
    %52 = arith.mulf %50, %51 : vector<8x8xf32>
    %cst_21 = arith.constant dense<0xFF800000> : vector<8xf32>
    %53 = vector.multi_reduction <maximumf>, %52, %cst_21 [1] : vector<8x8xf32> to vector<8xf32>
    %54 = vector.shape_cast %53 : vector<8xf32> to vector<8x1xf32>
    %55 = vector.broadcast %54 : vector<8x1xf32> to vector<8x8xf32>
    %56 = arith.subf %52, %55 : vector<8x8xf32>
    %57 = math.exp %56 : vector<8x8xf32>
    %cst_22 = arith.constant dense<0.000000e+00> : vector<8xf32>
    %58 = vector.multi_reduction <add>, %57, %cst_22 [1] : vector<8x8xf32> to vector<8xf32>
    %59 = vector.shape_cast %58 : vector<8xf32> to vector<8x1xf32>
    %60 = tpu.reciprocal %59 {approx = true} : vector<8x1xf32> -> vector<8x1xf32>
    %61 = vector.broadcast %60 : vector<8x1xf32> to vector<8x8xf32>
    %62 = arith.mulf %57, %61 : vector<8x8xf32>
    %cst_23 = arith.constant dense<0.000000e+00> : vector<8x16xf32>
    %63 = tpu.matmul %62, %49, %cst_23 {dimension_numbers = #tpu.dot_dimension_numbers<[1], [0], [0], [1], [0, 0, 1, 1], [], []>} : vector<8x8xf32>, vector<8x16xf32>, vector<8x16xf32> -> vector<8x16xf32>
    %64 = vector.extract_strided_slice %10 {offsets = [0, 48], sizes = [8, 16], strides = [1, 1]} : vector<8x64xf32> to vector<8x16xf32>
    %65 = vector.extract_strided_slice %11 {offsets = [0, 48], sizes = [8, 16], strides = [1, 1]} : vector<8x64xf32> to vector<8x16xf32>
    %66 = vector.extract_strided_slice %12 {offsets = [0, 48], sizes = [8, 16], strides = [1, 1]} : vector<8x64xf32> to vector<8x16xf32>
    %cst_24 = arith.constant dense<0.000000e+00> : vector<8x8xf32>
    %67 = tpu.matmul %64, %65, %cst_24 {dimension_numbers = #tpu.dot_dimension_numbers<[1], [1], [0], [0], [0, 0, 1, 0], [], []>} : vector<8x16xf32>, vector<8x16xf32>, vector<8x8xf32> -> vector<8x8xf32>
    %cst_25 = arith.constant 0.176776692 : f32
    %68 = vector.broadcast %cst_25 : f32 to vector<8x8xf32>
    %69 = arith.mulf %67, %68 : vector<8x8xf32>
    %cst_26 = arith.constant dense<0xFF800000> : vector<8xf32>
    %70 = vector.multi_reduction <maximumf>, %69, %cst_26 [1] : vector<8x8xf32> to vector<8xf32>
    %71 = vector.shape_cast %70 : vector<8xf32> to vector<8x1xf32>
    %72 = vector.broadcast %71 : vector<8x1xf32> to vector<8x8xf32>
    %73 = arith.subf %69, %72 : vector<8x8xf32>
    %74 = math.exp %73 : vector<8x8xf32>
    %cst_27 = arith.constant dense<0.000000e+00> : vector<8xf32>
    %75 = vector.multi_reduction <add>, %74, %cst_27 [1] : vector<8x8xf32> to vector<8xf32>
    %76 = vector.shape_cast %75 : vector<8xf32> to vector<8x1xf32>
    %77 = tpu.reciprocal %76 {approx = true} : vector<8x1xf32> -> vector<8x1xf32>
    %78 = vector.broadcast %77 : vector<8x1xf32> to vector<8x8xf32>
    %79 = arith.mulf %74, %78 : vector<8x8xf32>
    %cst_28 = arith.constant dense<0.000000e+00> : vector<8x16xf32>
    %80 = tpu.matmul %79, %66, %cst_28 {dimension_numbers = #tpu.dot_dimension_numbers<[1], [0], [0], [1], [0, 0, 1, 1], [], []>} : vector<8x8xf32>, vector<8x16xf32>, vector<8x16xf32> -> vector<8x16xf32>
    %81 = vector.shape_cast %28 : vector<8x8xf32> to vector<1x8x8xf32>
    %82 = vector.shape_cast %45 : vector<8x8xf32> to vector<1x8x8xf32>
    %83 = vector.shape_cast %62 : vector<8x8xf32> to vector<1x8x8xf32>
    %84 = vector.shape_cast %79 : vector<8x8xf32> to vector<1x8x8xf32>
    %85 = tpu.concatenate %81, %82, %83, %84 in 0 : vector<1x8x8xf32>, vector<1x8x8xf32>, vector<1x8x8xf32>, vector<1x8x8xf32> -> vector<4x8x8xf32>
    %c0_29 = arith.constant 0 : index
    %c0_30 = arith.constant 0 : index
    %c0_31 = arith.constant 0 : index
    %c0_32 = arith.constant 0 : index
    %86 = vector.load %arg8[%c0_29, %c0_30, %c0_31, %c0_32] : memref<1x4x8x8xf32, #tpu.memory_space<vmem>>, vector<1x4x8x8xf32>
    %87 = vector.shape_cast %86 : vector<1x4x8x8xf32> to vector<4x8x8xf32>
    %88 = vector.shape_cast %85 : vector<4x8x8xf32> to vector<1x4x8x8xf32>
    tpu.vector_store %arg8[%c0_29, %c0_30, %c0_31, %c0_32], %88 {strides = array<i32>} : memref<1x4x8x8xf32, #tpu.memory_space<vmem>>, vector<1x4x8x8xf32>,
    %89 = tpu.concatenate %29, %46, %63, %80 in 1 : vector<8x16xf32>, vector<8x16xf32>, vector<8x16xf32>, vector<8x16xf32> -> vector<8x64xf32>
    %c0_33 = arith.constant 0 : index
    %c0_34 = arith.constant 0 : index
    %90 = vector.load %arg5[%c0_33, %c0_34] : memref<64x128xf32, #tpu.memory_space<vmem>>, vector<64x128xf32>
    %cst_35 = arith.constant dense<0.000000e+00> : vector<8x128xf32>
    %91 = tpu.matmul %89, %90, %cst_35 {dimension_numbers = #tpu.dot_dimension_numbers<[1], [0], [0], [1], [0, 0, 1, 1], [], []>} : vector<8x64xf32>, vector<64x128xf32>, vector<8x128xf32> -> vector<8x128xf32>
    %c0_36 = arith.constant 0 : index
    %c0_37 = arith.constant 0 : index
    %92 = vector.load %arg6[%c0_36, %c0_37] : memref<1x128xf32, #tpu.memory_space<vmem>>, vector<1x128xf32>
    %93 = vector.broadcast %92 : vector<1x128xf32> to vector<8x128xf32>
    %94 = arith.addf %91, %93 : vector<8x128xf32>
    %c0_38 = arith.constant 0 : index
    %c0_39 = arith.constant 0 : index
    %c0_40 = arith.constant 0 : index
    %95 = vector.load %arg7[%c0_38, %c0_39, %c0_40] : memref<1x8x128xf32, #tpu.memory_space<vmem>>, vector<1x8x128xf32>
    %96 = vector.shape_cast %95 : vector<1x8x128xf32> to vector<8x128xf32>
    %97 = vector.shape_cast %94 : vector<8x128xf32> to vector<1x8x128xf32>
    tpu.vector_store %arg7[%c0_38, %c0_39, %c0_40], %97 {strides = array<i32>} : memref<1x8x128xf32, #tpu.memory_space<vmem>>, vector<1x8x128xf32>,
    return
  }
  func.func @transform_0(%arg0: i32) -> (i32, i32, i32) {
    %c0_i32 = arith.constant 0 : i32
    %c0_i32_0 = arith.constant 0 : i32
    %c0_i32_1 = arith.constant 0 : i32
    return %arg0, %c0_i32, %c0_i32_0 : i32, i32, i32
  }
  func.func @transform_1(%arg0: i32) -> (i32, i32, i32) {
    %c0_i32 = arith.constant 0 : i32
    %c0_i32_0 = arith.constant 0 : i32
    %c0_i32_1 = arith.constant 0 : i32
    return %arg0, %c0_i32, %c0_i32_0 : i32, i32, i32
  }
  func.func @transform_2(%arg0: i32) -> (i32, i32) {
    %c0_i32 = arith.constant 0 : i32
    %c0_i32_0 = arith.constant 0 : i32
    %c0_i32_1 = arith.constant 0 : i32
    return %c0_i32, %c0_i32_0 : i32, i32
  }
  func.func @transform_3(%arg0: i32) -> (i32, i32) {
    %c0_i32 = arith.constant 0 : i32
    %c0_i32_0 = arith.constant 0 : i32
    %c0_i32_1 = arith.constant 0 : i32
    return %c0_i32, %c0_i32_0 : i32, i32
  }
  func.func @transform_4(%arg0: i32) -> (i32, i32) {
    %c0_i32 = arith.constant 0 : i32
    %c0_i32_0 = arith.constant 0 : i32
    %c0_i32_1 = arith.constant 0 : i32
    return %c0_i32, %c0_i32_0 : i32, i32
  }
  func.func @transform_5(%arg0: i32) -> (i32, i32) {
    %c0_i32 = arith.constant 0 : i32
    %c0_i32_0 = arith.constant 0 : i32
    %c0_i32_1 = arith.constant 0 : i32
    return %c0_i32, %c0_i32_0 : i32, i32
  }
  func.func @transform_6(%arg0: i32) -> (i32, i32, i32) {
    %c0_i32 = arith.constant 0 : i32
    %c0_i32_0 = arith.constant 0 : i32
    %c0_i32_1 = arith.constant 0 : i32
    return %arg0, %c0_i32, %c0_i32_0 : i32, i32, i32
  }
  func.func @transform_7(%arg0: i32) -> (i32, i32, i32, i32) {
    %c0_i32 = arith.constant 0 : i32
    %c0_i32_0 = arith.constant 0 : i32
    %c0_i32_1 = arith.constant 0 : i32
    %c0_i32_2 = arith.constant 0 : i32
    return %arg0, %c0_i32, %c0_i32_0, %c0_i32_1 : i32, i32, i32, i32
  }
}

</mosaic_0001>

<bundles_post_ra>
// kernel: tpu_custom_call.1
= control target key start
LH: loop header
LB: loop body
LE: loop exit
PB: predicated region body
PF: predicated region fallthrough
CT: control target
= control target key end

     0   :  { %s1642_s0 = inlined_call_operand.hbm [shape: f32[2,8,32], index: 0, kind: input, shape index: {}]   ;;  %s1643_s1 = inlined_call_operand.hbm [shape: f32[2,8,32], index: 1, kind: input, shape index: {}]   ;;  %s1644_s2 = inlined_call_operand.hbm [shape: f32[32,192], index: 2, kind: input, shape index: {}]   ;;  %s1645_s3 = inlined_call_operand.vmem [shape: f32[1,192], index: 3, kind: input, shape index: {}]   ;;  %s1646_s4 = inlined_call_operand.hbm [shape: f32[64,128], index: 4, kind: input, shape index: {}]   ;;  %s1647_s5 = inlined_call_operand.vmem [shape: f32[1,128], index: 5, kind: input, shape index: {}]   ;;  %s1648_s6 = inlined_call_operand.hbm [shape: f32[2,8,128], index: 6, kind: output, shape index: {0}]   ;;  %s1649_s7 = inlined_call_operand.hbm [shape: f32[2,4,8,8], index: 7, kind: output, shape index: {1}]  }
   0x1   :  { %1654 = sst [smem:[#allocation23_spill]] %s1644_s2 }
   0x2   :  { %1655 = sst [smem:[#allocation24_spill]] %s1646_s4 }
   0x3   :  { %13 = vsyncpa [#allocation3], 0 }
   0x4   :  { %15 = vsyncpa [#allocation3 + $0x1], 0 }
   0x5   :  { %16 = vsyncpa [#allocation6], 0 }
   0x6   :  { %18 = vsyncpa [#allocation6 + $0x1], 0 }
   0x7   :  { %19 = vsyncpa [#allocation9], 0 }
   0x8   :  { %20 = vsyncpa [#allocation4], 0 }
   0x9   :  { %22 = vsyncpa [#allocation4 + $0x1], 0 }
   0xa   :  { %23 = vsyncpa [#allocation12], 0 }
   0xb   :  { %25 = vsyncpa [#allocation12 + $0x1], 0  ;;  %s1384_s24 = smov 0   ;;  %s1386_s25 = smov 0  }
   0xc   :  { %s1388_s26 = smov 0   ;;  %s1390_s27 = smov 0  }
   0xd LB: > { %1656 = sst [smem:[#allocation19_spill]] %s1323_s26  ;;  %s1408_s8 = sadd.s32 4294967295, %s1327_s27   ;;  %s1327_s27 = sphi %s1390_s27, %s1670_s27   ;;  %s1323_s26 = sphi %s1388_s26, %s1672_s26   ;;  %s1319_s25 = sphi %s1386_s25, %s1674_s25   ;;  %s1315_s24 = sphi %s1384_s24, %s1673_s24  }
   0xe   : > { %1657 = sst [smem:[#allocation20_spill]] %s1327_s27  ;;  %p950_p0 = scmp.ge.s32.totalorder %s1327_s27, 1 }
   0xf   : > { %s1658_s2 = sld [smem:[#allocation23_spill]]  ;;  %p52_p1 = scmp.eq.s32.totalorder %s1408_s8, 0 }
  0x10   : > { %p224_p2 = scmp.lt.s32.totalorder %s1327_s27, 3  ;;  %s1329_s10 = smov [#allocation7]  }
  0x11   : > { %s237_s11 = sshll.u32 %s1329_s10, 4  ;;  %s1660_s4 = sld [smem:[#allocation24_spill]]  ;;  %s238_s11 = int_to_ptr.vmem [resolvable:$true] %s237_s11 }
  0x12   : > { %p1413_p3 = pnand %p950_p0, %p224_p2  ;;  %s1330_s15 = smov [#allocation8]  }
  0x13   : > { %s254_s16 = sshll.u32 %s1330_s15, 4  ;;  %s1331_s17 = smov 256   ;;  %s255_s16 = int_to_ptr.vmem [resolvable:$true] %s254_s16 }
  0x14   : > { %p1006_p4 = pneg %p1413_p3  ;;  %s1332_s18 = smov 16  }
  0x15   : > { %s235_s30 = sshll.u32 %s1658_s2, 4  ;;  %s1333_s19 = smov 128   ;;  %s236_s30 = int_to_ptr.hbm [resolvable:$true] %s235_s30 }
  0x16   : > { %p1007_p6 = pnand %p1006_p4, %p52_p1  ;;  %s1334_s20 = smov 8  }
  0x17   : > { %s252_s14 = sshll.u32 %s1660_s4, 4  ;;  %s949_s21 = sadd.s32 4294967294, %s1327_s27   ;;  %s253_s14 = int_to_ptr.hbm [resolvable:$true] %s252_s14 }
  0x18   : > { %1009 = dma.hbm_to_vmem [thread:$0]  (!%p1007_p6), %s236_s30, 1024, %s238_s11, [#allocation6], %s1331_s17, %s1331_s17, %s1332_s18  }
  0x19   : > { %1012 = dma.hbm_to_vmem [thread:$0]  (!%p1007_p6), %s253_s14, 1024, %s255_s16, [#allocation9], %s1333_s19, %s1333_s19, %s1334_s20  }
  0x1a   : > { %s1427_s22 = sadd.s32 1, %s1327_s27   ;;  %s38_s28 = sadd.s32 1, %s1323_s26 }
  0x1b   : > { %1661 = sst [smem:[#allocation21_spill]] %s1427_s22  ;;  %s35_s23 = ssub.s32 %s1327_s27, %s1427_s22 }
  0x1c   : > { %p36_p7 = scmp.eq.s32.totalorder %s35_s23, 0  ;;  %p45_p8 = scmp.ne.s32.totalorder %s1323_s26, %s1319_s25 }
  0x1d   : > { %p46_p9 = scmp.eq.s32.totalorder %s1327_s27, 0  ;;  %p51_p10 = scmp.ne.s32.totalorder %s1319_s25, %s1315_s24 }
  0x1e   : > { %s1438_s29 = scalar_select %p36_p7, %s1323_s26, %s38_s28  }
  0x1f   : > { %p1440_p11 = por %p46_p9, %p45_p8  ;;  %p1446_p12 = por %p52_p1, %p51_p10 }
  0x20   : > { %1662 = sst [smem:[#allocation22_spill]] %s1438_s29  ;;  %p185_p13 = scmp.eq.s32.totalorder %s1408_s8, 1 }
  0x21   : > { %p191_p0 = scmp.eq.s32.totalorder %s949_s21, 1  ;;  %p1029_p2 = scmp.lt.s32.totalorder %s1327_s27, 2 }
  0x22   : > { %s271_s11 = sand.u32 1, %s1323_s26   ;;  %p1453_p4 = por %p185_p13, %p45_p8 }
  0x23   : > { %p1457_p6 = por %p191_p0, %p51_p10  ;;  %s1461_s14 = sshll.u32 %s271_s11, 3 }
  0x24   : > { %s955_s15 = sshll.u32 %s1327_s27, 3  ;;  %s275_s19 = scalar_lea.vmem [#allocation2], %s1461_s14 }
  0x25   : > { %s279_s18 = scalar_lea.hbm %s1642_s0, %s955_s15  ;;  %s283_s20 = sshll.u32 %s275_s19, 4  ;;  %s284_s20 = int_to_ptr.vmem [resolvable:$true] %s283_s20 }
  0x26   : > { %s281_s21 = sshll.u32 %s279_s18, 4  ;;  %p1470_p7 = pnand %p1029_p2, %p1440_p11  ;;  %s282_s21 = int_to_ptr.hbm [resolvable:$true] %s281_s21 }
  0x27   : > { %s298_s4 = scalar_lea.hbm %s1643_s1, %s955_s15  ;;  %s290_s29 = sand.u32 1, %s1327_s27  }
  0x28   : > { %s272_s26 = scalar_lea.sflag [#allocation3], %s271_s11  ;;  %s1157_s16 = sshra.s32 %s282_s21, 4  ;;  %s1158_s16 = int_to_ptr.hbm [resolvable:$true] %s1157_s16 }
  0x29   : > { %s1159_s17 = scalar_lea.hbm %s1158_s16, 8  ;;  %p1161_p9 = pneg %p1470_p7 }
  0x2a   : > { %p1160_p8 = scmp.ne.s32.totalorder %s1158_s16, %s1159_s17  ;;  %s1164_s19 = scalar_lea.hbm %s1642_s0, 16 }
  0x2b   : > { %p1165_p13 = scmp.lt.s32.totalorder %s1158_s16, %s1642_s0  ;;  %p1166_p0 = scmp.lt.s32.totalorder %s1164_s19, %s1159_s17 }
  0x2c   : > { %p1162_p10 = pnand %p1161_p9, %p1160_p8 }
  0x2d   : > { %p1167_p2 = por %p1166_p0, %p1165_p13 }
  0x2e   : > { %p1163_p11 = pneg %p1162_p10 }
  0x30   : > { %p1168_p5 = pnand %p1167_p2, %p1163_p11 }
  0x32   : > { %1171 = shalt.err (!%p1168_p5)
}
  0x33   : > { %1016 = dma.hbm_to_vmem [thread:$0]  (!%p1470_p7), %s282_s21, 128, %s284_s20, %s272_s26  }
  0x34   : > { %s300_s11 = sshll.u32 %s298_s4, 4  ;;  %s294_s15 = scalar_lea.vmem [#allocation5], %s1461_s14  ;;  %s301_s11 = int_to_ptr.hbm [resolvable:$true] %s300_s11 }
  0x35   : > { %s302_s22 = sshll.u32 %s294_s15, 4  ;;  %s291_s30 = scalar_lea.sflag [#allocation6], %s290_s29  ;;  %s303_s22 = int_to_ptr.vmem [resolvable:$true] %s302_s22 }
  0x36   : > { %s1187_s18 = sshra.s32 %s301_s11, 4  ;;  %s1194_s19 = scalar_lea.hbm %s1643_s1, 16  ;;  %s1188_s18 = int_to_ptr.hbm [resolvable:$true] %s1187_s18 }
  0x37   : > { %s1189_s27 = scalar_lea.hbm %s1188_s18, 8  ;;  %p1195_p5 = scmp.lt.s32.totalorder %s1188_s18, %s1643_s1 }
  0x38   : > { %p1190_p8 = scmp.ne.s32.totalorder %s1188_s18, %s1189_s27  ;;  %p1196_p13 = scmp.lt.s32.totalorder %s1194_s19, %s1189_s27 }
  0x3a   : > { %p1192_p10 = pnand %p1190_p8, %p1161_p9  ;;  %p1197_p0 = por %p1196_p13, %p1195_p5 }
  0x3c   : > { %p1193_p11 = pneg %p1192_p10 }
  0x3e   : > { %p1198_p2 = pnand %p1197_p0, %p1193_p11 }
  0x40   : > { %1201 = shalt.err (!%p1198_p2)
}
  0x41   : > { %1019 = dma.hbm_to_vmem [thread:$0]  (!%p1470_p7), %s301_s11, 128, %s303_s22, %s291_s30  }
  0x42   : > { %311 = sbr.rel (%p1413_p3) target bundleno = 1140 (0x474), region = 44  ;;  %s1506_s4 = sand.u32 (!%p1413_p3), 1, %s1319_s25  }
  0x43   : > { %s1509_s29 = sshll.u32 (!%p1413_p3), %s1506_s4, 3  ;;  %s314_s14 = scalar_lea.sflag (!%p1413_p3), [#allocation3], %s1506_s4 }
  0x44   : > { %s317_s27 = scalar_lea.vmem (!%p1413_p3), [#allocation2], %s1509_s29 }
  0x47   : > { %1290 = dma.done.wait (%p1446_p12), %s314_s14, 128  }
  0x48   : > { %1292 = vsyncadd (%p1446_p12), %s314_s14, 4294967168  ;;  %s323_s9 = sand.u32 1, %s1408_s8   ;;  %s327_s20 = scalar_lea.vmem [#allocation5], %s1509_s29 }
  0x49   : > { %s324_s22 = scalar_lea.sflag [#allocation6], %s323_s9 }
  0x4a   : > { %1294 = dma.done.wait (%p1446_p12), %s324_s22, 128  }
  0x4b   : > { %1296 = vsyncadd (%p1446_p12), %s324_s22, 4294967168 }
  0x4c   : > { %1298 = dma.done.wait (%p52_p1), [#allocation6], 1024  }
  0x4d   : > { %1300 = vsyncadd (%p52_p1), [#allocation6], 4294966272 }
  0x4e   : > { %1302 = dma.done.wait (%p52_p1), [#allocation9], 1024  }
  0x4f   : > { %1304 = vsyncadd (%p52_p1), [#allocation9], 4294966272  ;;  %v387_v0 = vld [vmem:[#allocation7 + $0x30] sm:$0xff]  ;;  %v385_v1 = vld [vmem:[#allocation7 + $0x20] sm:$0xff]  ;;  %vm395_vm0 = vcmask 261120   ;;  %s1335_s23 = smov 96  }
  0x50   : > { %414 = vmatpush.msra.mxu0 %v387_v0  ;;  %v383_v2 = vld [vmem:[#allocation7 + $0x10] sm:$0xff]  ;;  %v381_v3 = vld [vmem:[#allocation7] sm:$0xff]  ;;  %s1336_s28 = smov 112   ;;  %s1337_s11 = smov 64   ;;  %vm449_vm1 = vcmask 130048   ;;  %v388_v18 = vld [vmem:[#allocation7 + $0x38] sm:$0xff] }
  0x51   : > { %v379_v4 = vld [vmem:[%s317_s27] sm:$0xff]  ;;  %s1338_s15 = smov 16   ;;  %s1339_s30 = smov 32   ;;  %v380_v10 = vld [vmem:[%s327_s20] sm:$0xff]  ;;  %436 = vmatpush.msra.mxu1 %v388_v18  ;;  %vm475_vm2 = vcmask 64512   ;;  %vm727_vm3 = vcmask 392192  }
  0x52   : > { %415 = vmatpush.msra.mxu0 %v385_v1  ;;  %v1535_v5 = vld [vmem:[%s1645_s3] sm:$0x3]  ;;  %s1340_s18 = smov 48   ;;  %s1341_s16 = smov 80   ;;  %v386_v19 = vld [vmem:[#allocation7 + $0x28] sm:$0xff]  ;;  %v384_v20 = vld [vmem:[#allocation7 + $0x18] sm:$0xff] }
  0x53   : > { %v391_v6 = vperm.slane %v1535_v5, 0  ;;  %437 = vmatpush.msra.mxu1 %v386_v19  ;;  %v382_v21 = vld [vmem:[#allocation7 + $0x8] sm:$0xff]  ;;  %v392_v38 = vperm.slane %v1535_v5, 1  ;;  %s964_s17 = sshll.u32 %s1506_s4, 5  ;;  %v731_v18 = vld [vmem:[#allocation8 + $0x10] sm:$0xff]  ;;  %vm741_vm4 = vcmask 523264  }
  0x54   : > { %416 = vmatpush.msra.mxu0 %v383_v2  ;;  %s1571_s19 = scalar_lea.vmem [#allocation11], %s964_s17  ;;  %v730_v19 = vld [vmem:[#allocation8 + $0x8] sm:$0xff]  ;;  %s989_s2 = sshll.u32 %s1408_s8, 5 }
  0x55   : > { %438 = vmatpush.msra.mxu1 %v384_v20  ;;  %v729_v20 = vld [vmem:[#allocation8] sm:$0xff]  ;;  %s797_s27 = scalar_lea.hbm %s1649_s7, %s989_s2  ;;  %s798_s9 = sshll.u32 %s1571_s19, 4  ;;  %s799_s9 = int_to_ptr.vmem [resolvable:$true] %s798_s9 }
  0x56   : > { %417 = vmatpush.msra.mxu0 %v381_v3  ;;  %s800_s22 = sshll.u32 %s797_s27, 4  ;;  %s772_s20 = scalar_lea.sflag [#allocation12], %s1506_s4  ;;  %s801_s22 = int_to_ptr.hbm [resolvable:$true] %s800_s22 }
  0x57   : > { %965 = vmatmul.msk.f32.vlgmr.msra.gmra.mxu0 %vm395_vm0, %v379_v4  ;;  %439 = vmatpush.msra.mxu1 %v382_v21  ;;  %s1231_s10 = sshra.s32 %s801_s22, 4  ;;  %s1232_s10 = int_to_ptr.hbm [resolvable:$true] %s1231_s10 }
  0x58   : > { %967 = vmatmul.msk.f32.vlgmr.msra.gmra.mxu1 %vm395_vm0, %v379_v4  ;;  %s1233_s21 = scalar_lea.hbm %s1232_s10, 32  ;;  %p1238_p7 = scmp.lt.s32.totalorder %s1232_s10, %s1649_s7 }
  0x59   : > { %p1234_p1 = scmp.ne.s32.totalorder %s1232_s10, %s1233_s21 }
  0x5b   : > { %p1235_p3 = pnand %p1234_p1, %p1453_p4 }
  0x5d   : > { %p1236_p12 = pneg %p1235_p3 }
  0x5f   : > { %966 = vmatmul.msk.f32.gmra.mxu0 %vm395_vm0, %v380_v10 }
  0x60   : > { %968 = vmatmul.msk.f32.gmra.mxu1 %vm395_vm0, %v380_v10  ;;  %v735_v10 = vld [vmem:[#allocation8 + $0x30] sm:$0xff] }
  0xd4   : > { %v419_v7 = vpop.f32.mrf.mxu0 }
  0xd5   : > { %v420_v8 = vadd.f32 %v419_v7, %v391_v6  ;;  %v441_v34 = vpop.f32.mrf.mxu1 }
  0xd7   : > { %577 = vrot.lane.b32.xlu2 %v420_v8, %s1335_s23  ;;  %510 = vrot.lane.b32.xlu1 %v420_v8, %s1336_s28 }
  0xd8   : > { %447 = vrot.lane.b32.xlu0 %v420_v8, %s1337_s11  ;;  %s1237_s11 = scalar_lea.hbm %s1649_s7, 64 }
  0xd9   : > { %p1239_p9 = scmp.lt.s32.totalorder %s1237_s11, %s1233_s21 }
  0xdb   : > { %p1240_p8 = por %p1239_p9, %p1238_p7 }
  0xdc   : > { %v422_v17 = vpop.f32.mrf.mxu0 }
  0xdd   : > { %v443_v39 = vpop.f32.mrf.mxu1  ;;  %v732_v17 = vld [vmem:[#allocation8 + $0x18] sm:$0xff]  ;;  %p1241_p10 = pnand %p1240_p8, %p1236_p12 }
  0xde   : > { %v444_v41 = vadd.f32 %v443_v39, %v392_v38 }
  0xdf   : > { %645 = vrot.lane.b32.xlu2 %v420_v8, %s1338_s15  ;;  %579 = vrot.lane.b32.xlu1 %v420_v8, %s1339_s30 }
  0xe0   : > { %512 = vrot.lane.b32.xlu0 %v420_v8, %s1340_s18 }
  0xe8   : > { %643 = vrot.lane.b32.xlu0 %v420_v8, %s1341_s16 }
 0x131   : > { %v578_v9 = vpop.permute.xlu2 %577 }
 0x139   : > { %v646_v11 = vpop.permute.xlu2 %645 }
 0x13a   : > { %978 = vmatpush.xpose.msk.msrb.mxu0 %vm449_vm1, %v646_v11  ;;  %v734_v11 = vld [vmem:[#allocation8 + $0x28] sm:$0xff] }
 0x149   : > { %v511_v12 = vpop.permute.xlu1 %510 }
 0x14a   : > { %v448_v13 = vpop.permute.xlu0 %447 }
 0x14b   : > { %969 = vmatpush.xpose.msk.msra.mxu2 %vm449_vm1, %v448_v13 }
 0x14e   : > { %970 = vmatmul.msk.f32.vlgmr.msra.gmra.mxu2 %vm449_vm1, %v420_v8 }
 0x14f   : > { %505 = vmatpush.msrb.mxu2 %v444_v41 }
 0x151   : > { %v580_v14 = vpop.permute.xlu1 %579 }
 0x152   : > { %v513_v15 = vpop.permute.xlu0 %512 }
 0x153   : > { %972 = vmatpush.xpose.msk.msra.mxu3 %vm449_vm1, %v513_v15 }
 0x156   : > { %973 = vmatmul.msk.f32.vlgmr.msra.gmra.mxu3 %vm449_vm1, %v511_v12 }
 0x157   : > { %975 = vmatpush.xpose.msk.msrb.mxu3 %vm449_vm1, %v580_v14 }
 0x15a   : > { %v644_v16 = vpop.permute.xlu0 %643 }
 0x15b   : > { %979 = vmatmul.msk.f32.vlgmr.msrb.gmra.mxu0 %vm449_vm1, %v644_v16  ;;  %v733_v16 = vld [vmem:[#allocation8 + $0x20] sm:$0xff] }
 0x15e   : > { %976 = vmatmul.msk.f32.vlgmr.msrb.gmra.mxu3 %vm449_vm1, %v578_v9  ;;  %v736_v9 = vld [vmem:[#allocation8 + $0x38] sm:$0xff] }
 0x15f   : > { %753 = vmatpush.msra.mxu3 %v736_v9 }
 0x161   : > { %754 = vmatpush.msra.mxu3 %v735_v10 }
 0x163   : > { %755 = vmatpush.msra.mxu3 %v734_v11 }
 0x165   : > { %756 = vmatpush.msra.mxu3 %v733_v16 }
 0x167   : > { %757 = vmatpush.msra.mxu3 %v732_v17 }
 0x169   : > { %758 = vmatpush.msra.mxu3 %v731_v18 }
 0x16b   : > { %759 = vmatpush.msra.mxu3 %v730_v19 }
 0x16d   : > { %760 = vmatpush.msra.mxu3 %v729_v20 }
 0x1d1   : > { %v471_v22 = vpop.f32.mrf.mxu2 }
 0x1d2   : > { %v474_v23 = vmul.f32 0.17677669, %v471_v22 }
 0x1d4   : > { %v476_v24 = vsel %vm475_vm2, %v474_v23, -inf }
 0x1d5   : > { %477 = vmax.xlane.f32.xlu1 %v476_v24 }
 0x1d8   : > { %v668_v28 = vpop.f32.mrf.mxu0 }
 0x1d9   : > { %v535_v25 = vpop.f32.mrf.mxu3  ;;  %v671_v29 = vmul.f32 0.17677669, %v668_v28 }
 0x1da   : > { %v538_v26 = vmul.f32 0.17677669, %v535_v25 }
 0x1db   : > { %v672_v33 = vsel %vm475_vm2, %v671_v29, -inf }
 0x1dc   : > { %v539_v27 = vsel %vm475_vm2, %v538_v26, -inf }
 0x1dd   : > { %540 = vmax.xlane.f32.xlu2 %v539_v27 }
 0x1e1   : > { %v602_v30 = vpop.f32.mrf.mxu3 }
 0x1e2   : > { %v605_v31 = vmul.f32 0.17677669, %v602_v30 }
 0x1e4   : > { %v606_v32 = vsel %vm475_vm2, %v605_v31, -inf }
 0x1e5   : > { %607 = vmax.xlane.f32.xlu0 %v606_v32  ;;  %673 = vmax.xlane.f32.xlu2 %v672_v33 }
 0x248   : > { %v478_v35 = vpop.xlane.xlu1 %477 }
 0x249   : > { %v479_v36 = vsub.f32 %v474_v23, %v478_v35 }
 0x24b   : > { %v480_v37 = vmul.f32 1.442695, %v479_v36 }
 0x24d   : > { %1081 = vpow2.f32 %v480_v37 }
 0x250   : > { %v541_v40 = vpop.xlane.xlu2 %540 }
 0x251   : > { %v542_v48 = vsub.f32 %v538_v26, %v541_v40 }
 0x253   : > { %v1082_v42 = vpop.eup %1081  ;;  %v543_v51 = vmul.f32 1.442695, %v542_v48 }
 0x254   : > { %v482_v43 = vsel %vm475_vm2, %v1082_v42, 0.0 }
 0x255   : > { %483 = vadd.xlane.f32.xlu1 %v482_v43 }
 0x258   : > { %v674_v44 = vpop.xlane.xlu2 %673  ;;  %v608_v45 = vpop.xlane.xlu0 %607 }
 0x259   : > { %v675_v46 = vsub.f32 %v671_v29, %v674_v44  ;;  %v609_v47 = vsub.f32 %v605_v31, %v608_v45 }
 0x25b   : > { %v676_v49 = vmul.f32 1.442695, %v675_v46  ;;  %v610_v50 = vmul.f32 1.442695, %v609_v47 }
 0x25d   : > { %1083 = vpow2.f32 %v676_v49 }
 0x25e   : > { %1085 = vpow2.f32 %v610_v50 }
 0x25f   : > { %1087 = vpow2.f32 %v543_v51 }
 0x263   : > { %v1084_v52 = vpop.eup %1083 }
 0x264   : > { %v1086_v53 = vpop.eup %1085  ;;  %v678_v54 = vsel %vm475_vm2, %v1084_v52, 0.0 }
 0x265   : > { %679 = vadd.xlane.f32.xlu2 %v678_v54  ;;  %v612_v55 = vsel %vm475_vm2, %v1086_v53, 0.0  ;;  %v1088_v56 = vpop.eup %1087 }
 0x266   : > { %613 = vadd.xlane.f32.xlu0 %v612_v55  ;;  %v545_v57 = vsel %vm475_vm2, %v1088_v56, 0.0 }
 0x26d   : > { %546 = vadd.xlane.f32.xlu2 %v545_v57 }
 0x26e   : > { %551 = vrot.lane.b32.xlu1 %v444_v41, %s1336_s28 }
 0x27a   : > { %617 = vrot.lane.b32.xlu0 %v444_v41, %s1335_s23 }
 0x285   : > { %683 = vrot.lane.b32.xlu2 %v444_v41, %s1341_s16 }
 0x2c8   : > { %v484_v58 = vpop.xlane.xlu1 %483 }
 0x2c9   : > { %1089 = vrcp.f32 %v484_v58 }
 0x2cf   : > { %v1090_v59 = vpop.eup %1089 }
 0x2d0   : > { %v486_v60 = vmul.f32 %v1090_v59, %v1082_v42 }
 0x2d2   : > { %971 = vmatmul.msk.f32.vlgmr.msrb.gmra.mxu2 %vm475_vm2, %v486_v60  ;;  %709 = vst.msk [vmem:[%s1571_s19] sm:$0xff] %vm475_vm2, %v486_v60 }
 0x2d8   : > { %v680_v61 = vpop.xlane.xlu2 %679 }
 0x2d9   : > { %1091 = vrcp.f32 %v680_v61  ;;  %v614_v62 = vpop.xlane.xlu0 %613 }
 0x2da   : > { %1093 = vrcp.f32 %v614_v62 }
 0x2df   : > { %v1092_v63 = vpop.eup %1091 }
 0x2e0   : > { %v1094_v0 = vpop.eup %1093  ;;  %v547_v1 = vpop.xlane.xlu2 %546  ;;  %v682_v3 = vmul.f32 %v1092_v63, %v1084_v52 }
 0x2e1   : > { %v552_v2 = vpop.permute.xlu1 %551  ;;  %v616_v4 = vmul.f32 %v1094_v0, %v1086_v53  ;;  %1095 = vrcp.f32 %v547_v1 }
 0x2e2   : > { %572 = vmatpush.msra.mxu2 %v552_v2  ;;  %712 = vst.msk [vmem:[%s1571_s19 + $0x18] sm:$0xff] %vm475_vm2, %v682_v3 }
 0x2e3   : > { %711 = vst.msk [vmem:[%s1571_s19 + $0x10] sm:$0xff] %vm475_vm2, %v616_v4 }
 0x2e7   : > { %v1096_v5 = vpop.eup %1095 }
 0x2e8   : > { %v549_v6 = vmul.f32 %v1096_v5, %v1088_v56  ;;  %v684_v7 = vpop.permute.xlu2 %683 }
 0x2e9   : > { %704 = vmatpush.msrb.mxu1 %v684_v7 }
 0x2ea   : > { %710 = vst.msk [vmem:[%s1571_s19 + $0x8] sm:$0xff] %vm475_vm2, %v549_v6  ;;  %974 = vmatmul.msk.f32.vlgmr.msra.gmra.mxu2 %vm475_vm2, %v549_v6  ;;  %980 = vmatmul.msk.f32.vlgmr.msrb.gmra.mxu1 %vm475_vm2, %v682_v3 }
 0x2ec   : > { %v618_v8 = vpop.permute.xlu0 %617 }
 0x2ed   : > { %638 = vmatpush.msrb.mxu2 %v618_v8 }
 0x2f2   : > { %977 = vmatmul.msk.f32.vlgmr.msrb.gmra.mxu2 %vm475_vm2, %v616_v4 }
 0x355   : > { %v507_v12 = vpop.f32.mrf.mxu2 }
 0x367   : > { %v706_v14 = vpop.f32.mrf.mxu1 }
 0x36d   : > { %v574_v13 = vpop.f32.mrf.mxu2 }
 0x36e   : > { %714 = vrot.lane.b32.xlu1 %v574_v13, %s1338_s15 }
 0x375   : > { %v640_v15 = vpop.f32.mrf.mxu2 }
 0x376   : > { %722 = vrot.lane.b32.xlu1 %v706_v14, %s1340_s18  ;;  %718 = vrot.lane.b32.xlu0 %v640_v15, %s1339_s30 }
 0x3e0   : > { %v715_v21 = vpop.permute.xlu1 %714 }
 0x3e1   : > { %v725_v22 = vsel %vm449_vm1, %v507_v12, %v715_v21 }
 0x3e8   : > { %v723_v23 = vpop.permute.xlu1 %722  ;;  %v719_v24 = vpop.permute.xlu0 %718 }
 0x3e9   : > { %v726_v25 = vsel %vm395_vm0, %v725_v22, %v719_v24 }
 0x3ea   : > { %v728_v26 = vsel %vm727_vm3, %v726_v25, %v723_v23 }
 0x3eb   : > { %981 = vmatmul.msk.f32.vlgmr.msra.gmra.mxu3 %vm741_vm4, %v728_v26 }
 0x3ec   : > { %1244 = shalt.err (!%p1241_p10)
}
 0x3ed   : > { %s1342_s18 = smov 128   ;;  %s1343_s16 = smov 8   ;;  %v1080_v27 = vld [vmem:[%s1647_s5] ss:$0 sm:$0xff] }
 0x3ee   : > { %1003 = dma.vmem_to_hbm [thread:$0]  (%p1453_p4), %s799_s9, 512, %s801_s22, %s772_s20, %s1342_s18, %s1342_s18, %s1343_s16  }
 0x3ef   : > { %s984_s17 = sshll.u32 %s1408_s8, 3  ;;  %s371_s10 = scalar_lea.vmem [#allocation10], %s1509_s29 }
 0x3f0   : > { %s782_s26 = scalar_lea.hbm %s1648_s6, %s984_s17  ;;  %s784_s21 = sshll.u32 %s371_s10, 4  ;;  %s785_s21 = int_to_ptr.vmem [resolvable:$true] %s784_s21 }
 0x3f1   : > { %s786_s23 = sshll.u32 %s782_s26, 4  ;;  %s767_s28 = scalar_lea.sflag [#allocation4], %s1506_s4  ;;  %s787_s23 = int_to_ptr.hbm [resolvable:$true] %s786_s23 }
 0x3f2   : > { %s1259_s9 = sshra.s32 %s787_s23, 4  ;;  %s1265_s11 = scalar_lea.hbm %s1648_s6, 16  ;;  %s1260_s9 = int_to_ptr.hbm [resolvable:$true] %s1259_s9 }
 0x3f3   : > { %s1261_s8 = scalar_lea.hbm %s1260_s9, 8  ;;  %p1266_p0 = scmp.lt.s32.totalorder %s1260_s9, %s1648_s6 }
 0x3f4   : > { %p1262_p11 = scmp.ne.s32.totalorder %s1260_s9, %s1261_s8  ;;  %p1267_p2 = scmp.lt.s32.totalorder %s1265_s11, %s1261_s8 }
 0x3f6   : > { %p1263_p5 = pnand %p1262_p11, %p1453_p4  ;;  %p1268_p1 = por %p1267_p2, %p1266_p0 }
 0x3f8   : > { %p1264_p13 = pneg %p1263_p5 }
 0x3fa   : > { %p1269_p3 = pnand %p1268_p1, %p1264_p13 }
 0x46e   : > { %v762_v28 = vpop.f32.mrf.mxu3 }
 0x46f   : > { %v763_v29 = vadd.f32 %v1080_v27, %v762_v28 }
 0x471   : > { %765 = vst [vmem:[%s371_s10] sm:$0xff] %v763_v29 }
 0x472   : > { %1272 = shalt.err (!%p1269_p3)
}
 0x473   : > { %1002 = dma.vmem_to_hbm [thread:$0]  (%p1453_p4), %s785_s21, 128, %s787_s23, %s767_s28  }
 0x474 PF: > { %s1668_s4 = sld [smem:[#allocation20_spill]]  ;;  %s815_s30 = sand.u32 1, %s1315_s24  }
 0x475   : > { %s816_s18 = scalar_lea.sflag [#allocation4], %s815_s30 }
 0x47a   : > { %p1669_p12 = scmp.ge.s32.totalorder %s1668_s4, 2 }
 0x47c   : > { %p1021_p7 = pnand %p1669_p12, %p1457_p6 }
 0x47e   : > { %p1022_p9 = pneg %p1021_p7 }
 0x480   : > { %1306 = dma.done.wait (%p1022_p9), %s816_s18, 128  }
 0x481   : > { %1308 = vsyncadd (%p1022_p9), %s816_s18, 4294967168  ;;  %s826_s16 = scalar_lea.sflag [#allocation12], %s815_s30 }
 0x482   : > { %1310 = dma.done.wait (%p1022_p9), %s826_s16, 512  }
 0x483   : > { %1312 = vsyncadd (%p1022_p9), %s826_s16, 4294966784  ;;  %s1670_s27 = sld [smem:[#allocation21_spill]]  ;;  %s1673_s24 = smov %s1319_s25 }
 0x484   : > { %s1671_s17 = sld [smem:[#allocation19_spill]] }
 0x485   : > { %s1672_s26 = sld [smem:[#allocation22_spill]] }
 0x489   : > { %p28_p4 = scmp.ge.s32.totalorder %s1670_s27, 4  }
 0x48a   : > { %s1674_s25 = smov %s1671_s17 }
 0x48b   :  { %30 = sbr.rel (!%p28_p4) target bundleno = 13 (0xd), region = 127 }
 0x490   :  { %832 = vsyncpa [#allocation3], 1 }
 0x491   :  { %834 = vsyncpa [#allocation3 + $0x1], 1 }
 0x492   :  { %835 = vsyncpa [#allocation6], 1 }
 0x493   :  { %837 = vsyncpa [#allocation6 + $0x1], 1 }
 0x494   :  { %838 = vsyncpa [#allocation9], 1 }
 0x495   :  { %839 = vsyncpa [#allocation4], 1 }
 0x496   :  { %841 = vsyncpa [#allocation4 + $0x1], 1 }
 0x497   :  { %842 = vsyncpa [#allocation12], 1 }
 0x498   :  { %844 = vsyncpa [#allocation12 + $0x1], 1 }

</bundles_post_ra>
